<compile_context>
chip_gen: v7x
topology: tpu7x:2x2x1
jax: 0.10.0
libtpu: 0.0.40
codegen_flags: <defaults>
</compile_context>

<pallas_src>
import functools

import jax
import jax.numpy as jnp
from jax.experimental import pallas as pl
from jax.experimental.pallas import tpu as pltpu


def _round_up(x: int, m: int) -> int:
    return (x + m - 1) // m * m


def _round_down(x: int, m: int) -> int:
    return (x // m) * m


def _nn_critic_kernel(s_ref, w1_ref, b1_ref, w2_ref, b2_ref, w3_ref, b3_ref,
                      out_ref, *, use_tanh: bool):
    """One batch-tile: fc1 -> act -> fc2 -> act -> fc3 (value row, lane-major)."""
    act = jnp.tanh if use_tanh else (lambda x: jnp.maximum(x, 0.0))

    # MXU matmuls in bf16 with f32 accumulation; elementwise math stays f32.
    s = s_ref[...]                                               # (tile_b, S) bf16
    h1 = act(jnp.dot(s, w1_ref[...],
                     preferred_element_type=jnp.float32) + b1_ref[...])
    h2 = act(jnp.dot(h1.astype(jnp.bfloat16), w2_ref[...],
                     preferred_element_type=jnp.float32) + b2_ref[...])

    # fc3 (hidden -> 1): w3 is stored as a (1, hp) row.  Elementwise mul +
    # lane reduce (VPU + XLU) avoids a degenerate N=1 MXU pass.
    v_col = jnp.sum(h2 * w3_ref[...], axis=-1, keepdims=True)    # (tile_b, 1) f32

    # Re-layout batch into lanes (XLU is idle here) so the output block
    # (1, tile_b) is lane-dense and its HBM writeback is contiguous.
    v_row = jnp.transpose(v_col) + b3_ref[...]                   # (1, tile_b)
    out_ref[...] = v_row.astype(out_ref.dtype)


def _pad_params(w1, b1, w2, b2, w3, b3):
    """Zero-pad hidden dim to 128 lanes; matmul weights cast to bf16."""
    state_dim, hidden = w1.shape
    hp = _round_up(hidden, 128)

    w1p = jnp.zeros((state_dim, hp), jnp.float32).at[:, :hidden].set(w1)
    b1p = jnp.zeros((1, hp), jnp.float32).at[:, :hidden].set(jnp.reshape(b1, (1, -1)))
    w2p = jnp.zeros((hp, hp), jnp.float32).at[:hidden, :hidden].set(w2)
    b2p = jnp.zeros((1, hp), jnp.float32).at[:, :hidden].set(jnp.reshape(b2, (1, -1)))
    # value head stored as a row (1, hp) in f32 (used elementwise, not on MXU)
    w3p = jnp.zeros((1, hp), jnp.float32).at[:, :hidden].set(jnp.reshape(w3, (1, -1)))
    b3p = jnp.asarray(b3, jnp.float32).reshape(1, 1)

    return (w1p.astype(jnp.bfloat16), b1p,
            w2p.astype(jnp.bfloat16), b2p,
            w3p, b3p)


def nn_critic_forward(s, w1, b1, w2, b2, w3, b3, *,
                      use_tanh: bool = True, tile_b: int = 1024):
    batch, state_dim = s.shape
    hidden = w1.shape[1]

    w1p, b1p, w2p, b2p, w3p, b3p = _pad_params(w1, b1, w2, b2, w3, b3)
    hp = w1p.shape[1]

    # Single bf16 cast of the activation stream (matmul precision is bf16 anyway).
    s_bf = s if s.dtype == jnp.bfloat16 else s.astype(jnp.bfloat16)

    # ---- batch tile selection ------------------------------------------------
    # Prefer large, 128-multiple tiles (lane-dense output, HBM roofline), but:
    #   * keep >= 2 grid steps for medium/large batches so the "parallel" axis
    #     can shard across both TensorCores on v7x,
    #   * never let a block exceed the array (tiny batches => one small tile,
    #     no full-batch padding copy of s).
    tile_b = max(128, _round_up(int(tile_b), 128))
    if batch >= 256:
        tile_b = min(tile_b, _round_up(pl.cdiv(batch, 2), 128))
    if batch >= 8:
        tile_b = min(tile_b, _round_down(batch, 8))
    else:
        tile_b = batch

    num_tiles = pl.cdiv(batch, tile_b)
    grid = (num_tiles,)
    kernel = functools.partial(_nn_critic_kernel, use_tanh=use_tanh)

    # Weights / biases: constant index_map -> DMA'd once, VMEM-resident.
    const = lambda shape: pl.BlockSpec(shape, lambda i: (0,) * len(shape))

    cost = pl.CostEstimate(
        flops=2 * batch * (state_dim * hidden + hidden * hidden + hidden),
        transcendentals=(2 * batch * hidden) if use_tanh else 0,
        bytes_accessed=(batch * state_dim * 2 + batch * 4
                        + (state_dim * hp + hp * hp) * 2 + (2 * hp + hp + 1) * 4),
    )

    out = pl.pallas_call(
        kernel,
        out_shape=jax.ShapeDtypeStruct((num_tiles, 1, tile_b), jnp.float32),
        grid=grid,
        in_specs=[
            pl.BlockSpec((tile_b, state_dim), lambda i: (i, 0)),
            const(w1p.shape), const(b1p.shape),
            const(w2p.shape), const(b2p.shape),
            const(w3p.shape), const(b3p.shape),
        ],
        # Lane-major value output: one (1, tile_b) row per grid step.
        out_specs=pl.BlockSpec((None, 1, tile_b), lambda i: (i, 0, 0)),
        compiler_params=pltpu.CompilerParams(
            dimension_semantics=("parallel",)),
        cost_estimate=cost,
    )(s_bf, w1p, b1p, w2p, b2p, w3p, b3p)

    # (num_tiles, 1, tile_b) -> (batch, 1); only real rows are kept (partial
    # last tile rows / lane padding hold garbage from out-of-range inputs).
    return out.reshape(-1)[:batch][:, None]


def init_params(key, state_dim, hidden_width, out_dim=1):
    """Deterministic synthetic init (weights stored as [in_features, out_features]).

    # TODO(synk): orthogonal_init (weight-init only) is replaced by a plain
    # scaled-normal init; it does not change the forward-pass semantics.
    """
    ks = jax.random.split(key, 6)
    scale1 = 1.0 / jnp.sqrt(state_dim)
    scale2 = 1.0 / jnp.sqrt(hidden_width)
    w1 = jax.random.normal(ks[0], (state_dim, hidden_width), jnp.float32) * scale1
    b1 = jax.random.normal(ks[1], (1, hidden_width), jnp.float32) * 0.01
    w2 = jax.random.normal(ks[2], (hidden_width, hidden_width), jnp.float32) * scale2
    b2 = jax.random.normal(ks[3], (1, hidden_width), jnp.float32) * 0.01
    w3 = jax.random.normal(ks[4], (hidden_width, out_dim), jnp.float32) * scale2
    b3 = jax.random.normal(ks[5], (1, out_dim), jnp.float32) * 0.01
    return w1, b1, w2, b2, w3, b3


def _reference(s, w1, b1, w2, b2, w3, b3, *, use_tanh=True, bf16_dots=True):
    """Pure-JAX reference mirroring the kernel's dtype pattern
    (fc1/fc2 bf16-in f32-acc, fc3 in f32) when bf16_dots=True."""
    act = jnp.tanh if use_tanh else (lambda x: jnp.maximum(x, 0.0))
    cast = (lambda x: x.astype(jnp.bfloat16)) if bf16_dots else (lambda x: x)
    h1 = act(jnp.dot(cast(s), cast(w1), preferred_element_type=jnp.float32) + b1)
    h2 = act(jnp.dot(cast(h1), cast(w2), preferred_element_type=jnp.float32) + b2)
    return jnp.dot(h2, w3.astype(jnp.float32),
                   preferred_element_type=jnp.float32) + b3


if __name__ == "__main__":
    # Shapes consistent with the module: state_dim=16, hidden_width=32,
    # value head of width 1.  use_tanh=1 -> tanh activation.
    state_dim, hidden_width = 16, 32

    key = jax.random.PRNGKey(0)
    k_s, k_s2, k_s3, k_p = jax.random.split(key, 4)
    w1, b1, w2, b2, w3, b3 = init_params(k_p, state_dim, hidden_width)

    # --- run 1: tiny batch (single small tile, no padding) --------------------
    batch = 8
    s = jax.random.normal(k_s, (batch, state_dim), jnp.float32)
    v = jax.block_until_ready(
        nn_critic_forward(s, w1, b1, w2, b2, w3, b3, use_tanh=True))
    assert v.shape == (batch, 1)
    ref_bf16 = _reference(s, w1, b1, w2, b2, w3, b3, use_tanh=True, bf16_dots=True)
    ref_f32 = _reference(s, w1, b1, w2, b2, w3, b3, use_tanh=True, bf16_dots=False)
    assert bool(jnp.all(jnp.abs(v - ref_bf16) < 1e-4))
    assert bool(jnp.all(jnp.abs(v - ref_f32) < 2e-2))

    # --- run 2: batch not a multiple of the tile (multi-step grid, partial tile)
    batch2 = 300
    s2 = jax.random.normal(k_s2, (batch2, state_dim), jnp.float32)
    v2 = jax.block_until_ready(
        nn_critic_forward(s2, w1, b1, w2, b2, w3, b3, use_tanh=True))
    assert v2.shape == (batch2, 1)
    ref2 = _reference(s2, w1, b1, w2, b2, w3, b3, use_tanh=True, bf16_dots=True)
    assert bool(jnp.all(jnp.abs(v2 - ref2) < 1e-4))

    # --- run 3: relu path ------------------------------------------------------
    batch3 = 64
    s3 = jax.random.normal(k_s3, (batch3, state_dim), jnp.float32)
    v3 = jax.block_until_ready(
        nn_critic_forward(s3, w1, b1, w2, b2, w3, b3, use_tanh=False))
    assert v3.shape == (batch3, 1)
    ref3 = _reference(s3, w1, b1, w2, b2, w3, b3, use_tanh=False, bf16_dots=True)
    assert bool(jnp.all(jnp.abs(v3 - ref3) < 1e-4))

    print("KERNEL_OK")
</pallas_src>

<mosaic_0001>
module attributes {stable_mosaic.version = 11 : i64} {
  func.func @_nn_critic_kernel(%arg0: i32, %arg1: memref<8x16xbf16, #tpu.memory_space<vmem>>, %arg2: memref<16x128xbf16, #tpu.memory_space<vmem>>, %arg3: memref<1x128xf32, #tpu.memory_space<vmem>>, %arg4: memref<128x128xbf16, #tpu.memory_space<vmem>>, %arg5: memref<1x128xf32, #tpu.memory_space<vmem>>, %arg6: memref<1x128xf32, #tpu.memory_space<vmem>>, %arg7: memref<1x1xf32, #tpu.memory_space<vmem>>, %arg8: memref<1x1x8xf32, #tpu.memory_space<vmem>>) attributes {dimension_semantics = [#tpu.dimension_semantics<parallel>], iteration_bounds = array<i64: 1>, scalar_prefetch = 0 : i64, scratch_operands = 0 : i64, tpu.core_type = #tpu.core_type<tc>, window_params = [{transform_indices = @transform_0, window_bounds = array<i64: 8, 16>}, {pipeline_mode = #tpu.pipeline_mode<synchronous>, transform_indices = @transform_1, window_bounds = array<i64: 16, 128>}, {pipeline_mode = #tpu.pipeline_mode<synchronous>, transform_indices = @transform_2, window_bounds = array<i64: 1, 128>}, {pipeline_mode = #tpu.pipeline_mode<synchronous>, transform_indices = @transform_3, window_bounds = array<i64: 128, 128>}, {pipeline_mode = #tpu.pipeline_mode<synchronous>, transform_indices = @transform_4, window_bounds = array<i64: 1, 128>}, {pipeline_mode = #tpu.pipeline_mode<synchronous>, transform_indices = @transform_5, window_bounds = array<i64: 1, 128>}, {pipeline_mode = #tpu.pipeline_mode<synchronous>, transform_indices = @transform_6, window_bounds = array<i64: 1, 1>}, {transform_indices = @transform_7, window_bounds = array<i64: 1, 1, 8>}]} {
    %c0 = arith.constant 0 : index
    %c0_0 = arith.constant 0 : index
    %0 = vector.load %arg1[%c0, %c0_0] : memref<8x16xbf16, #tpu.memory_space<vmem>>, vector<8x16xbf16>
    %c0_1 = arith.constant 0 : index
    %c0_2 = arith.constant 0 : index
    %1 = vector.load %arg2[%c0_1, %c0_2] : memref<16x128xbf16, #tpu.memory_space<vmem>>, vector<16x128xbf16>
    %cst = arith.constant dense<0.000000e+00> : vector<8x128xf32>
    %2 = tpu.matmul %0, %1, %cst {dimension_numbers = #tpu.dot_dimension_numbers<[1], [0], [0], [1], [0, 0, 1, 1], [], []>} : vector<8x16xbf16>, vector<16x128xbf16>, vector<8x128xf32> -> vector<8x128xf32>
    %c0_3 = arith.constant 0 : index
    %c0_4 = arith.constant 0 : index
    %3 = vector.load %arg3[%c0_3, %c0_4] : memref<1x128xf32, #tpu.memory_space<vmem>>, vector<1x128xf32>
    %4 = vector.broadcast %3 : vector<1x128xf32> to vector<8x128xf32>
    %5 = arith.addf %2, %4 : vector<8x128xf32>
    %6 = math.tanh %5 : vector<8x128xf32>
    %7 = arith.truncf %6 : vector<8x128xf32> to vector<8x128xbf16>
    %c0_5 = arith.constant 0 : index
    %c0_6 = arith.constant 0 : index
    %8 = vector.load %arg4[%c0_5, %c0_6] : memref<128x128xbf16, #tpu.memory_space<vmem>>, vector<128x128xbf16>
    %cst_7 = arith.constant dense<0.000000e+00> : vector<8x128xf32>
    %9 = tpu.matmul %7, %8, %cst_7 {dimension_numbers = #tpu.dot_dimension_numbers<[1], [0], [0], [1], [0, 0, 1, 1], [], []>} : vector<8x128xbf16>, vector<128x128xbf16>, vector<8x128xf32> -> vector<8x128xf32>
    %c0_8 = arith.constant 0 : index
    %c0_9 = arith.constant 0 : index
    %10 = vector.load %arg5[%c0_8, %c0_9] : memref<1x128xf32, #tpu.memory_space<vmem>>, vector<1x128xf32>
    %11 = vector.broadcast %10 : vector<1x128xf32> to vector<8x128xf32>
    %12 = arith.addf %9, %11 : vector<8x128xf32>
    %13 = math.tanh %12 : vector<8x128xf32>
    %c0_10 = arith.constant 0 : index
    %c0_11 = arith.constant 0 : index
    %14 = vector.load %arg6[%c0_10, %c0_11] : memref<1x128xf32, #tpu.memory_space<vmem>>, vector<1x128xf32>
    %15 = vector.broadcast %14 : vector<1x128xf32> to vector<8x128xf32>
    %16 = arith.mulf %13, %15 : vector<8x128xf32>
    %cst_12 = arith.constant dense<0.000000e+00> : vector<8xf32>
    %17 = vector.multi_reduction <add>, %16, %cst_12 [1] : vector<8x128xf32> to vector<8xf32>
    %18 = vector.shape_cast %17 : vector<8xf32> to vector<8x1xf32>
    %19 = tpu.transpose %18, [1, 0] : vector<8x1xf32> -> vector<1x8xf32>
    %c0_13 = arith.constant 0 : index
    %c0_14 = arith.constant 0 : index
    %20 = vector.load %arg7[%c0_13, %c0_14] : memref<1x1xf32, #tpu.memory_space<vmem>>, vector<1x1xf32>
    %21 = vector.broadcast %20 : vector<1x1xf32> to vector<1x8xf32>
    %22 = arith.addf %19, %21 : vector<1x8xf32>
    %c0_15 = arith.constant 0 : index
    %c0_16 = arith.constant 0 : index
    %c0_17 = arith.constant 0 : index
    %23 = vector.load %arg8[%c0_15, %c0_16, %c0_17] : memref<1x1x8xf32, #tpu.memory_space<vmem>>, vector<1x1x8xf32>
    %24 = vector.shape_cast %23 : vector<1x1x8xf32> to vector<1x8xf32>
    %25 = vector.shape_cast %22 : vector<1x8xf32> to vector<1x1x8xf32>
    tpu.vector_store %arg8[%c0_15, %c0_16, %c0_17], %25 {strides = array<i32>} : memref<1x1x8xf32, #tpu.memory_space<vmem>>, vector<1x1x8xf32>,
    return
  }
  func.func @transform_0(%arg0: i32) -> (i32, i32) {
    %c0_i32 = arith.constant 0 : i32
    %c0_i32_0 = arith.constant 0 : i32
    return %arg0, %c0_i32 : i32, i32
  }
  func.func @transform_1(%arg0: i32) -> (i32, i32) {
    %c0_i32 = arith.constant 0 : i32
    %c0_i32_0 = arith.constant 0 : i32
    %c0_i32_1 = arith.constant 0 : i32
    return %c0_i32, %c0_i32_0 : i32, i32
  }
  func.func @transform_2(%arg0: i32) -> (i32, i32) {
    %c0_i32 = arith.constant 0 : i32
    %c0_i32_0 = arith.constant 0 : i32
    %c0_i32_1 = arith.constant 0 : i32
    return %c0_i32, %c0_i32_0 : i32, i32
  }
  func.func @transform_3(%arg0: i32) -> (i32, i32) {
    %c0_i32 = arith.constant 0 : i32
    %c0_i32_0 = arith.constant 0 : i32
    %c0_i32_1 = arith.constant 0 : i32
    return %c0_i32, %c0_i32_0 : i32, i32
  }
  func.func @transform_4(%arg0: i32) -> (i32, i32) {
    %c0_i32 = arith.constant 0 : i32
    %c0_i32_0 = arith.constant 0 : i32
    %c0_i32_1 = arith.constant 0 : i32
    return %c0_i32, %c0_i32_0 : i32, i32
  }
  func.func @transform_5(%arg0: i32) -> (i32, i32) {
    %c0_i32 = arith.constant 0 : i32
    %c0_i32_0 = arith.constant 0 : i32
    %c0_i32_1 = arith.constant 0 : i32
    return %c0_i32, %c0_i32_0 : i32, i32
  }
  func.func @transform_6(%arg0: i32) -> (i32, i32) {
    %c0_i32 = arith.constant 0 : i32
    %c0_i32_0 = arith.constant 0 : i32
    %c0_i32_1 = arith.constant 0 : i32
    return %c0_i32, %c0_i32_0 : i32, i32
  }
  func.func @transform_7(%arg0: i32) -> (i32, i32, i32) {
    %c0_i32 = arith.constant 0 : i32
    %c0_i32_0 = arith.constant 0 : i32
    %c0_i32_1 = arith.constant 0 : i32
    return %arg0, %c0_i32, %c0_i32_0 : i32, i32, i32
  }
}

</mosaic_0001>

<bundles_post_ra>
// kernel: tpu_custom_call.1
= control target key start
LH: loop header
LB: loop body
LE: loop exit
PB: predicated region body
PF: predicated region fallthrough
CT: control target
= control target key end

     0   :  { %s596_s0 = inlined_call_operand.hbm [shape: bf16[8,16], index: 0, kind: input, shape index: {}]   ;;  %s597_s1 = inlined_call_operand.hbm [shape: bf16[16,128], index: 1, kind: input, shape index: {}]   ;;  %s598_s2 = inlined_call_operand.vmem [shape: f32[1,128], index: 2, kind: input, shape index: {}]   ;;  %s599_s3 = inlined_call_operand.hbm [shape: bf16[128,128], index: 3, kind: input, shape index: {}]   ;;  %s600_s4 = inlined_call_operand.vmem [shape: f32[1,128], index: 4, kind: input, shape index: {}]   ;;  %s601_s5 = inlined_call_operand.vmem [shape: f32[1,128], index: 5, kind: input, shape index: {}]   ;;  %s602_s6 = inlined_call_operand.<no memory space> [shape: f32[1,1], index: 6, kind: input, shape index: {}]   ;;  %s603_s7 = inlined_call_operand.hbm [shape: f32[1,1,8], index: 7, kind: output, shape index: {}]  }
   0x1   :  { %v12_v0 = vstv %s602_s6 }
   0x2   :  { %13 = vst [vmem:[#allocation2] sm:$0x1] %v12_v0 }
   0x3   :  { %14 = vsyncpa [#allocation4], 0 }
   0x4   :  { %15 = vsyncpa [#allocation7], 0 }
   0x5   :  { %16 = vsyncpa [#allocation5], 0  ;;  %s481_s26 = smov [#allocation6]   ;;  %s387_s30 = scalar_lea.hbm %s597_s1, 128 }
   0x6   :  { %s32_s27 = sshll.u32 %s481_s26, 4  ;;  %p388_p0 = scmp.ne.s32.totalorder %s597_s1, %s387_s30  ;;  %s33_s27 = int_to_ptr.vmem [resolvable:$true] %s32_s27 }
   0x7   :  { %p391_p1 = scmp.lt.u32.totalorder %s387_s30, %s597_s1 }
   0x9   :  { %p393_p2 = pnand %p391_p1, %p388_p0 }
   0xb   :  { %396 = shalt.err (!%p393_p2)
}
   0xc   :  { %s397_s6 = scalar_lea.vmem %s33_s27, 128  ;;  %p402_p4 = scmp.lt.s32.totalorder %s33_s27, %s33_s27 }
   0xd   :  { %p398_p3 = scmp.ne.s32.totalorder %s33_s27, %s397_s6  ;;  %p403_p5 = scmp.lt.s32.totalorder %s397_s6, %s397_s6 }
   0xf   :  { %p404_p6 = por %p403_p5, %p402_p4 }
  0x11   :  { %p405_p7 = pnand %p404_p6, %p398_p3 }
  0x13   :  { %408 = shalt.err (!%p405_p7)
}
  0x14   :  { %s482_s12 = smov 64   ;;  %s483_s13 = smov 4  }
  0x15   :  { %38 = dma.hbm_to_vmem [thread:$0]  %s597_s1, 128, %s33_s27, [#allocation7], %s482_s12, %s482_s12, %s483_s13  }
  0x16   :  { %s484_s16 = smov [#allocation3]   ;;  %s485_s18 = smov [#allocation8]  }
  0x17   :  { %s23_s17 = sshll.u32 %s484_s16, 4  ;;  %s46_s19 = sshll.u32 %s485_s18, 4  ;;  %s24_s17 = int_to_ptr.vmem [resolvable:$true] %s23_s17  ;;  %s47_s19 = int_to_ptr.vmem [resolvable:$true] %s46_s19 }
  0x18   :  { %s409_s22 = scalar_lea.hbm %s596_s0, 64 }
  0x19   :  { %p410_p8 = scmp.ne.s32.totalorder %s596_s0, %s409_s22  ;;  %p413_p9 = scmp.lt.u32.totalorder %s409_s22, %s596_s0 }
  0x1b   :  { %p415_p10 = pnand %p413_p9, %p410_p8 }
  0x1d   :  { %418 = shalt.err (!%p415_p10)
}
  0x1e   :  { %s419_s1 = scalar_lea.vmem %s24_s17, 64  ;;  %p424_p12 = scmp.lt.s32.totalorder %s24_s17, %s24_s17 }
  0x1f   :  { %p420_p11 = scmp.ne.s32.totalorder %s24_s17, %s419_s1  ;;  %p425_p13 = scmp.lt.s32.totalorder %s419_s1, %s419_s1 }
  0x21   :  { %p426_p0 = por %p425_p13, %p424_p12 }
  0x23   :  { %p427_p1 = pnand %p426_p0, %p420_p11 }
  0x25   :  { %430 = shalt.err (!%p427_p1)
}
  0x26   :  { %26 = dma.hbm_to_vmem [thread:$0]  %s596_s0, 64, %s24_s17, [#allocation4]  }
  0x27   :  { %s431_s8 = scalar_lea.hbm %s599_s3, 1024 }
  0x28   :  { %p432_p2 = scmp.ne.s32.totalorder %s599_s3, %s431_s8  ;;  %p435_p3 = scmp.lt.u32.totalorder %s431_s8, %s599_s3 }
  0x2a   :  { %p437_p4 = pnand %p435_p3, %p432_p2 }
  0x2c   :  { %440 = shalt.err (!%p437_p4)
}
  0x2d   :  { %s441_s14 = scalar_lea.vmem %s47_s19, 1024  ;;  %p446_p6 = scmp.lt.s32.totalorder %s47_s19, %s47_s19 }
  0x2e   :  { %p442_p5 = scmp.ne.s32.totalorder %s47_s19, %s441_s14  ;;  %p447_p7 = scmp.lt.s32.totalorder %s441_s14, %s441_s14 }
  0x30   :  { %p448_p8 = por %p447_p7, %p446_p6 }
  0x32   :  { %p449_p9 = pnand %p448_p8, %p442_p5 }
  0x34   :  { %452 = shalt.err (!%p449_p9)
}
  0x35   :  { %52 = dma.hbm_to_vmem [thread:$0]  %s599_s3, 1024, %s47_s19, [#allocation7], %s482_s12, %s482_s12, %s483_s13  }
  0x36   :  { %475 = dma.done.wait [#allocation4], 64  }
  0x37   :  { %476 = vsyncadd [#allocation4], 4294967232 }
  0x38   :  { %477 = dma.done.wait [#allocation7], 1152  }
  0x39   :  { %478 = vsyncadd [#allocation7], 4294966144  ;;  %v486_v1 = vmov 0.0   ;;  %vm487_vm0 = vmmov 0   ;;  %v374_v2 = vld [vmem:[#allocation6] sm:$0xff]   ;;  %vm85_vm1 = vcmask 130048   ;;  %v291_v32 = vlaneseq }
  0x3a   :  { %338 = vmatprep.subr.bf16.mxu0 %v486_v1  ;;  %340 = vmatprep.mubr.msk.bf16.mxu0 %vm487_vm0, %v486_v1  ;;  %v69_v3 = vld [vmem:[#allocation3] sm:$0xf]  ;;  %v375_v4 = vld [vmem:[#allocation8] sm:$0xff]   ;;  %v376_v5 = vld [vmem:[#allocation8 + $0x8] sm:$0xff]   ;;  %v488_v20 = vmov 0   ;;  %vm296_vm2 = vcmask 57344  }
  0x3b   :  { %344 = vmatprep.subr.bf16.mxu1 %v486_v1  ;;  %360 = vmatprep.mubr.msk.bf16.mxu1 %vm487_vm0, %v486_v1  ;;  %v377_v6 = vld [vmem:[#allocation8 + $0x10] sm:$0xff]   ;;  %v378_v7 = vld [vmem:[#allocation8 + $0x18] sm:$0xff]   ;;  %v379_v8 = vld [vmem:[#allocation8 + $0x20] sm:$0xff]   ;;  %v292_v33 = vshrl.u32 %v291_v32, 7 }
  0x3c   :  { %339 = vmatpush3.bf16.msra.mxu0 %v374_v2  ;;  %345 = vmatpush3.bf16.msra.mxu1 %v375_v4  ;;  %v380_v9 = vld [vmem:[#allocation8 + $0x28] sm:$0xff]   ;;  %v381_v10 = vld [vmem:[#allocation8 + $0x30] sm:$0xff]   ;;  %v382_v11 = vld [vmem:[#allocation8 + $0x38] sm:$0xff]  }
  0x3d   :  { %346 = vmatprep.subr.bf16.mxu1 %v486_v1  ;;  %v314_v12 = vld [vmem:[%s598_s2] ss:$0 sm:$0xff]  ;;  %373 = vset.pattern.permute.xlu0 %v488_v20  ;;  %v293_v34 = vsub.s32 0, %v292_v33 }
  0x3e   :  { %v317_v21 = vld [vmem:[%s600_s4] ss:$0 sm:$0xff]  ;;  %s489_s4 = smov [#allocation9]  }
  0x3f   :  { %341 = vmatmul.mubr.msk.bf16.vlgmr.msra.gmra.mrb[0].mxu0 %vm85_vm1, %v69_v3  ;;  %v326_v27 = vld [vmem:[%s601_s5] ss:$0 sm:$0xff]  ;;  %s304_s18 = sshll.u32 %s489_s4, 4  ;;  %s305_s18 = int_to_ptr.vmem [resolvable:$true] %s304_s18 }
  0x40   :  { %347 = vmatpush3.bf16.msra.mxu1 %v376_v5  ;;  %v285_v30 = vld [vmem:[#allocation2] sm:$0x1]  ;;  %s453_s5 = scalar_lea.vmem %s305_s18, 16  ;;  %s457_s19 = scalar_lea.vmem %s305_s18, 32 }
  0x41   :  { %348 = vmatprep.subr.bf16.mxu1 %v486_v1  ;;  %p454_p10 = scmp.ne.s32.totalorder %s305_s18, %s453_s5  ;;  %p458_p11 = scmp.lt.s32.totalorder %s305_s18, %s305_s18 }
  0x42   :  { %p459_p12 = scmp.lt.s32.totalorder %s457_s19, %s453_s5 }
  0x44   :  { %349 = vmatpush3.bf16.msra.mxu1 %v377_v6  ;;  %p460_p13 = por %p459_p12, %p458_p11 }
  0x45   :  { %350 = vmatprep.subr.bf16.mxu1 %v486_v1 }
  0x46   :  { %p461_p0 = pnand %p460_p13, %p454_p10 }
  0x48   :  { %351 = vmatpush3.bf16.msra.mxu1 %v378_v7 }
  0x49   :  { %352 = vmatprep.subr.bf16.mxu1 %v486_v1 }
  0x4c   :  { %353 = vmatpush3.bf16.msra.mxu1 %v379_v8 }
  0x4d   :  { %354 = vmatprep.subr.bf16.mxu1 %v486_v1 }
  0x50   :  { %355 = vmatpush3.bf16.msra.mxu1 %v380_v9 }
  0x51   :  { %356 = vmatprep.subr.bf16.mxu1 %v486_v1 }
  0x54   :  { %357 = vmatpush3.bf16.msra.mxu1 %v381_v10 }
  0x55   :  { %358 = vmatprep.subr.bf16.mxu1 %v486_v1 }
  0x58   :  { %359 = vmatpush3.bf16.msra.mxu1 %v382_v11 }
 0x112   :  { %v123_v13 = vpop.f32.mrb[0].mxu0 }
 0x113   :  { %v124_v14 = vadd.f32 %v314_v12, %v123_v13  ;;  %v342_v15 = vpop.f32.mrb[1].mxu0 }
 0x114   :  { %v126_v16 = vpop.f32.mrb[2].mxu0 }
 0x115   :  { %383 = vtanh.f32 %v124_v14  ;;  %v343_v17 = vpop.f32.mrb[3].mxu0 }
 0x11f   :  { %v384_v18 = vpop.eup %383 }
 0x120   :  { %v130_v19 = vpack.c.bf16 %v384_v18, %v384_v18 }
 0x122   :  { %361 = vmatmul.mubr.bf16.vlgmr.msra.gmra.mrb[0].mxu1 %v130_v19 }
 0x1f5   :  { %v236_v22 = vpop.f32.mrb[0].mxu1 }
 0x1f6   :  { %v237_v23 = vadd.f32 %v317_v21, %v236_v22  ;;  %v362_v24 = vpop.f32.mrb[1].mxu1 }
 0x1f7   :  { %v239_v25 = vpop.f32.mrb[2].mxu1 }
 0x1f8   :  { %385 = vtanh.f32 %v237_v23  ;;  %v363_v26 = vpop.f32.mrb[3].mxu1 }
 0x202   :  { %v386_v28 = vpop.eup %385 }
 0x203   :  { %v250_v29 = vmul.f32 %v386_v28, %v326_v27 }
 0x205   :  { %251 = vadd.xlane.f32.xlu0 %v250_v29 }
 0x21b   :  { %288 = vperm.xlu0 %373, %v285_v30  }
 0x292   :  { %v252_v31 = vpop.xlane.xlu0 %251 }
 0x293   :  { %253 = vxpose.xlu1.b32.start.end [1/1] (short) (narrow) %v252_v31, 8 }
 0x29a   :  { %v289_v35 = vpop.permute.xlu0 %288 }
 0x29b   :  { %v294_v36 = vrot.slane %v289_v35, %v293_v34 }
 0x313   :  { %v269_v37 = vpop.trf.xlu1 }
 0x314   :  { %v295_v38 = vadd.f32 %v294_v36, %v269_v37 }
 0x316   :  { %297 = vst.msk [vmem:[#allocation9] sm:$0x1] %vm296_vm2, %v295_v38 }
 0x317   :  { %464 = shalt.err (!%p461_p0)
}
 0x318   :  { %s465_s22 = scalar_lea.hbm %s603_s7, 16 }
 0x319   :  { %p466_p1 = scmp.ne.s32.totalorder %s603_s7, %s465_s22  ;;  %p469_p2 = scmp.lt.u32.totalorder %s465_s22, %s603_s7 }
 0x31b   :  { %p471_p3 = pnand %p469_p2, %p466_p1 }
 0x31d   :  { %474 = shalt.err (!%p471_p3)
}
 0x31e   :  { %307 = dma.vmem_to_hbm [thread:$0]  %s305_s18, 16, %s603_s7, [#allocation5]  }
 0x31f   :  { %479 = dma.done.wait [#allocation5], 16  }
 0x320   :  { %480 = vsyncadd [#allocation5], 4294967280 }
 0x321   :  { %311 = vsyncpa [#allocation4], 1 }
 0x322   :  { %312 = vsyncpa [#allocation7], 1 }
 0x323   :  { %313 = vsyncpa [#allocation5], 1 }

</bundles_post_ra>
